<compile_context>
chip_gen: v5e
topology: v5e:2x2
jax: 0.10.0
libtpu: 0.0.40
codegen_flags: <defaults>
</compile_context>

<pallas_src>
import functools

import numpy as np
import jax
import jax.numpy as jnp
from jax import lax
from jax.experimental import pallas as pl
from jax.experimental.pallas import tpu as pltpu


# ----------------------------------------------------------------------------
# Pallas kernel: one grid step processes n_batch masks (mirrors the PyTorch
# loop `for i in range(0, n_masks, n_batch)`), accumulating an un-normalized
# partial saliency into the resident per-core output block.
# ----------------------------------------------------------------------------
def rise_kernel(m_ref, w_ref, b_ref, o_ref, *, n_cls_acc):
    @pl.when(pl.program_id(1) == 0)
    def _():
        o_ref[...] = jnp.zeros_like(o_ref)

    masks = m_ref[...]                                       # (n_batch, HW) bf16

    # "model": linear classifier over the masked image (image folded into W_eff,
    # so masks @ W_eff == (masks * x flattened) @ W).  128-lane padded N is free.
    logits = jnp.dot(masks, w_ref[...],
                     preferred_element_type=jnp.float32)     # (n_batch, 128)

    # From here on only the real (sublane-rounded) class rows are used.
    logits = logits[:, :n_cls_acc] + b_ref[...]              # padded bias = -1e30

    # softmax over classes (dim=1 in PyTorch); padded classes -> prob exactly 0
    m_max = jnp.max(logits, axis=-1, keepdims=True)
    e = jnp.exp(logits - m_max)
    denom = jnp.sum(e, axis=-1, keepdims=True)
    probs = e * pl.reciprocal(denom, approx=True)            # (n_batch, n_cls_acc)

    # saliency accumulation: contract over the mask-batch axis (== probs^T @ masks)
    # without materializing a transpose; output stays (n_cls_acc, HW), lane-dense.
    # NOTE: probs are cast to bf16 for the MXU; over ~10k masks this drifts a bit
    # from an f32 reference, which is acceptable for a saliency map.
    o_ref[...] += lax.dot_general(
        probs.astype(jnp.bfloat16), masks,
        dimension_numbers=(((0,), (0,)), ((), ())),
        preferred_element_type=jnp.float32)


def rise_saliency(masks_flat, x_flat, w_cls, b_cls, *, n_masks, p1, n_batch,
                  n_split=2, n_cls_pad=128):
    """Returns the normalized saliency map, shape (n_classes, HW)."""
    C, HW = x_flat.shape
    n_classes = w_cls.shape[1]
    n_cls_acc = max(8, ((n_classes + 7) // 8) * 8)           # sublane-rounded classes
    assert n_cls_acc <= n_cls_pad
    assert n_masks % (n_split * n_batch) == 0
    steps = n_masks // (n_split * n_batch)                    # inner (reduction) axis
    grid = (n_split, steps)

    # Fold the image into the classifier weights once (model is linear):
    #   W_eff[p, cls] = sum_c x[c, p] * W[c*HW + p, cls]
    w_eff = jnp.einsum("cp,cpn->pn", x_flat,
                       w_cls.reshape(C, HW, n_classes))       # (HW, n_classes) f32

    # Pad the class (lane) dim of W_eff to 128 with zeros for the MXU matmul; pad
    # the bias only to n_cls_acc with -1e30 so padded classes get softmax prob 0.
    w_eff_p = jnp.pad(w_eff, ((0, 0), (0, n_cls_pad - n_classes))
                      ).astype(jnp.bfloat16)
    b_pad = jnp.pad(b_cls.astype(jnp.float32),
                    ((0, 0), (0, n_cls_acc - n_classes)),
                    constant_values=-1e30)
    # On v6e, raising n_batch to 256 (masks tile (256, HW)) fully fills the
    # 256-deep MXU contraction and halves grid-step overhead; keep 128 on v5e.
    masks_bf16 = masks_flat.astype(jnp.bfloat16)

    # VMEM plan (per TensorCore), counted at the actual pipeline depth:
    #   masks tile double-buffered, W_eff/bias single-buffered (Buffered(1),
    #   constant index map never re-DMAs), small f32 partial output double-buffered.
    footprint = (2 * n_batch * HW * 2            # masks, bf16, 2 buffers
                 + 1 * HW * n_cls_pad * 2        # W_eff, bf16, Buffered(1)
                 + 8 * 128 * 4                   # bias tile (padded), Buffered(1)
                 + 2 * n_cls_acc * HW * 4)       # partial saliency accumulator, f32
    try:
        vmem_cap = pltpu.get_tpu_info().vmem_capacity_bytes
    except Exception:
        vmem_cap = 64 * 2**20                    # conservative (v7x per-TC)
    vmem_limit = int(min(max(footprint + (4 << 20), 32 << 20),
                         int(vmem_cap * 0.9)))   # headroom for Mosaic scratch

    kern = functools.partial(rise_kernel, n_cls_acc=n_cls_acc)
    partial_out = pl.pallas_call(
        kern,
        out_shape=jax.ShapeDtypeStruct((n_split, n_cls_acc, HW), jnp.float32),
        grid_spec=pltpu.PrefetchScalarGridSpec(
            num_scalar_prefetch=0,
            grid=grid,
            in_specs=[
                # masks tile: per-core slice of the mask range, double-buffered
                pl.BlockSpec((n_batch, HW), lambda c, i: (c * steps + i, 0)),
                # folded classifier weights: resident, single-buffered
                pl.BlockSpec((HW, n_cls_pad), lambda c, i: (0, 0),
                             pipeline_mode=pl.Buffered(1)),
                # bias (already sliced to n_cls_acc): resident, single-buffered
                pl.BlockSpec((1, n_cls_acc), lambda c, i: (0, 0),
                             pipeline_mode=pl.Buffered(1)),
            ],
            # per-core partial saliency block; resident across the reduction axis
            out_specs=pl.BlockSpec((None, n_cls_acc, HW), lambda c, i: (c, 0, 0)),
        ),
        compiler_params=pltpu.CompilerParams(
            dimension_semantics=("parallel", "arbitrary"),
            vmem_limit_bytes=vmem_limit),
    )(masks_bf16, w_eff_p, b_pad)

    # Tiny JAX epilogue: sum the per-core partials, scale, per-class min/max
    # normalization (exact divides; negligible cost at (n_classes, HW)).
    sal = jnp.sum(partial_out, axis=0)[:n_classes] / (n_masks * p1)
    mn = jnp.min(sal, axis=-1, keepdims=True)
    sal = sal - mn
    mx = jnp.max(sal, axis=-1, keepdims=True)
    return jnp.where(mx > 0.0, sal / mx, sal)


# ----------------------------------------------------------------------------
# Mask generation (glue / parameter setup; mirrors RISE.generate_masks, which
# uses `torch.randn(...) < p1` — standard-normal threshold — then bilinear
# upsample and a random crop).
# ----------------------------------------------------------------------------
def generate_masks(key, n_masks, p1, input_size, initial_mask_size):
    Ch = int(np.ceil(input_size[0] / initial_mask_size[0]))
    Cw = int(np.ceil(input_size[1] / initial_mask_size[1]))
    resize_h = int((initial_mask_size[0] + 1) * Ch)
    resize_w = int((initial_mask_size[1] + 1) * Cw)

    k1, k2, k3 = jax.random.split(key, 3)
    binary = (jax.random.normal(
        k1, (n_masks, 1, initial_mask_size[0], initial_mask_size[1])) < p1
    ).astype(jnp.float32)
    up = jax.image.resize(binary, (n_masks, 1, resize_h, resize_w),
                          method="bilinear")
    ii = jax.random.randint(k2, (n_masks,), 0, Ch)
    jj = jax.random.randint(k3, (n_masks,), 0, Cw)

    def crop(m, i, j):
        return jax.lax.dynamic_slice(m, (0, i, j),
                                     (1, input_size[0], input_size[1]))

    masks = jax.vmap(crop)(up, ii, jj)          # (n_masks, 1, H, W)
    return masks


# ----------------------------------------------------------------------------
# Pure-JAX reference (semantics of RISE.forward with a linear "model"), f32.
# ----------------------------------------------------------------------------
def rise_reference(masks, x, w_cls, b_cls, n_masks, p1):
    H, W = x.shape[2], x.shape[3]
    masked_x = masks * x                                       # (n_masks, C, H, W)
    flat = masked_x.reshape(n_masks, -1)                       # (n_masks, C*H*W)
    logits = flat @ w_cls + b_cls[0]                           # (n_masks, n_classes)
    probs = jax.nn.softmax(logits, axis=1)
    sal = probs.T @ masks.reshape(n_masks, -1)                 # (n_classes, H*W)
    sal = sal.reshape(-1, H, W) / (n_masks * p1)
    n_classes = sal.shape[0]
    mn = sal.reshape(n_classes, -1).min(axis=1)
    sal = sal - mn[:, None, None]
    mx = sal.reshape(n_classes, -1).max(axis=1)
    sal = sal / mx[:, None, None]
    return sal


if __name__ == "__main__":
    # Small shapes consistent with RISE (scaled down from 224x224 / 10000 masks)
    n_masks = 256
    p1 = 0.1
    input_size = (16, 16)
    initial_mask_size = (4, 4)
    n_batch = 128            # MXU-sized M tile (use 256 on v6e at real scale)
    n_split = 2              # mask range split across TensorCores (v7x megacore)
    C = 4
    n_classes = 8
    H, W = input_size
    HW = H * W

    key = jax.random.PRNGKey(0)
    k_mask, k_x, k_w, k_b = jax.random.split(key, 4)

    # Deterministic masks, input image (NCHW), and synthetic linear "model"
    masks = generate_masks(k_mask, n_masks, p1, input_size, initial_mask_size)
    x = jax.random.normal(k_x, (1, C, H, W), jnp.float32)
    w_cls = jax.random.normal(k_w, (C * HW, n_classes), jnp.float32) * 0.05
    b_cls = jax.random.normal(k_b, (1, n_classes), jnp.float32) * 0.1

    # Flatten for the kernel
    masks_flat = masks.reshape(n_masks, HW)
    x_flat = x.reshape(C, HW)

    sal_flat = rise_saliency(masks_flat, x_flat, w_cls, b_cls,
                             n_masks=n_masks, p1=p1, n_batch=n_batch,
                             n_split=n_split)
    saliency = sal_flat.reshape(n_classes, H, W)
    jax.block_until_ready(saliency)

    # Correctness check against pure-f32 JAX reference (kernel uses bf16 MXU
    # operands + an approx softmax reciprocal, hence the looser tolerance).
    ref = rise_reference(masks, x, w_cls, b_cls, n_masks, p1)
    err = float(jnp.max(jnp.abs(saliency - ref)))
    assert saliency.shape == (n_classes, H, W)
    assert err < 2e-2, f"max abs error {err}"
    print("KERNEL_OK")
</pallas_src>

<mosaic_0001>
module attributes {stable_mosaic.version = 11 : i64} {
  func.func @rise_kernel(%arg0: i32, %arg1: i32, %arg2: memref<128x256xbf16, #tpu.memory_space<vmem>>, %arg3: memref<256x128xbf16, #tpu.memory_space<vmem>>, %arg4: memref<1x8xf32, #tpu.memory_space<vmem>>, %arg5: memref<1x8x256xf32, #tpu.memory_space<vmem>>) attributes {dimension_semantics = [#tpu.dimension_semantics<parallel>, #tpu.dimension_semantics<arbitrary>], iteration_bounds = array<i64: 2, 1>, scalar_prefetch = 0 : i64, scratch_operands = 0 : i64, tpu.core_type = #tpu.core_type<tc>, window_params = [{transform_indices = @transform_0, window_bounds = array<i64: 128, 256>}, {pipeline_mode = #tpu.pipeline_mode<synchronous>, transform_indices = @transform_1, window_bounds = array<i64: 256, 128>}, {pipeline_mode = #tpu.pipeline_mode<synchronous>, transform_indices = @transform_2, window_bounds = array<i64: 1, 8>}, {transform_indices = @transform_3, window_bounds = array<i64: 1, 8, 256>}]} {
    %c0_i32 = arith.constant 0 : i32
    %0 = arith.cmpi eq, %arg1, %c0_i32 : i32
    %1 = arith.extui %0 : i1 to i32
    %c0_i32_0 = arith.constant 0 : i32
    %2 = arith.cmpi ne, %1, %c0_i32_0 : i32
    scf.if %2 {
      %cst_15 = arith.constant 0.000000e+00 : f32
      %28 = vector.broadcast %cst_15 : f32 to vector<8x256xf32>
      %c0_16 = arith.constant 0 : index
      %c0_17 = arith.constant 0 : index
      %c0_18 = arith.constant 0 : index
      %29 = vector.load %arg5[%c0_16, %c0_17, %c0_18] : memref<1x8x256xf32, #tpu.memory_space<vmem>>, vector<1x8x256xf32>
      %30 = vector.shape_cast %29 : vector<1x8x256xf32> to vector<8x256xf32>
      %31 = vector.shape_cast %28 : vector<8x256xf32> to vector<1x8x256xf32>
      tpu.vector_store %arg5[%c0_16, %c0_17, %c0_18], %31 {strides = array<i32>} : memref<1x8x256xf32, #tpu.memory_space<vmem>>, vector<1x8x256xf32>,
    } else {
    }
    %c0 = arith.constant 0 : index
    %c0_1 = arith.constant 0 : index
    %3 = vector.load %arg2[%c0, %c0_1] : memref<128x256xbf16, #tpu.memory_space<vmem>>, vector<128x256xbf16>
    %c0_2 = arith.constant 0 : index
    %c0_3 = arith.constant 0 : index
    %4 = vector.load %arg3[%c0_2, %c0_3] : memref<256x128xbf16, #tpu.memory_space<vmem>>, vector<256x128xbf16>
    %cst = arith.constant dense<0.000000e+00> : vector<128x128xf32>
    %5 = tpu.matmul %3, %4, %cst {dimension_numbers = #tpu.dot_dimension_numbers<[1], [0], [0], [1], [0, 0, 1, 1], [], []>} : vector<128x256xbf16>, vector<256x128xbf16>, vector<128x128xf32> -> vector<128x128xf32>
    %6 = vector.extract_strided_slice %5 {offsets = [0, 0], sizes = [128, 8], strides = [1, 1]} : vector<128x128xf32> to vector<128x8xf32>
    %c0_4 = arith.constant 0 : index
    %c0_5 = arith.constant 0 : index
    %7 = vector.load %arg4[%c0_4, %c0_5] : memref<1x8xf32, #tpu.memory_space<vmem>>, vector<1x8xf32>
    %8 = vector.broadcast %7 : vector<1x8xf32> to vector<128x8xf32>
    %9 = arith.addf %6, %8 : vector<128x8xf32>
    %cst_6 = arith.constant dense<0xFF800000> : vector<128xf32>
    %10 = vector.multi_reduction <maximumf>, %9, %cst_6 [1] : vector<128x8xf32> to vector<128xf32>
    %11 = vector.shape_cast %10 : vector<128xf32> to vector<128x1xf32>
    %12 = vector.broadcast %11 : vector<128x1xf32> to vector<128x8xf32>
    %13 = arith.subf %9, %12 : vector<128x8xf32>
    %14 = math.exp %13 : vector<128x8xf32>
    %cst_7 = arith.constant dense<0.000000e+00> : vector<128xf32>
    %15 = vector.multi_reduction <add>, %14, %cst_7 [1] : vector<128x8xf32> to vector<128xf32>
    %16 = vector.shape_cast %15 : vector<128xf32> to vector<128x1xf32>
    %17 = tpu.reciprocal %16 {approx = true} : vector<128x1xf32> -> vector<128x1xf32>
    %18 = vector.broadcast %17 : vector<128x1xf32> to vector<128x8xf32>
    %19 = arith.mulf %14, %18 : vector<128x8xf32>
    %c0_8 = arith.constant 0 : index
    %c0_9 = arith.constant 0 : index
    %c0_10 = arith.constant 0 : index
    %20 = vector.load %arg5[%c0_8, %c0_9, %c0_10] : memref<1x8x256xf32, #tpu.memory_space<vmem>>, vector<1x8x256xf32>
    %21 = vector.shape_cast %20 : vector<1x8x256xf32> to vector<8x256xf32>
    %22 = arith.truncf %19 : vector<128x8xf32> to vector<128x8xbf16>
    %cst_11 = arith.constant dense<0.000000e+00> : vector<8x256xf32>
    %23 = tpu.matmul %22, %3, %cst_11 {dimension_numbers = #tpu.dot_dimension_numbers<[0], [0], [1], [1], [0, 1, 1, 1], [], []>} : vector<128x8xbf16>, vector<128x256xbf16>, vector<8x256xf32> -> vector<8x256xf32>
    %24 = arith.addf %21, %23 : vector<8x256xf32>
    %c0_12 = arith.constant 0 : index
    %c0_13 = arith.constant 0 : index
    %c0_14 = arith.constant 0 : index
    %25 = vector.load %arg5[%c0_12, %c0_13, %c0_14] : memref<1x8x256xf32, #tpu.memory_space<vmem>>, vector<1x8x256xf32>
    %26 = vector.shape_cast %25 : vector<1x8x256xf32> to vector<8x256xf32>
    %27 = vector.shape_cast %24 : vector<8x256xf32> to vector<1x8x256xf32>
    tpu.vector_store %arg5[%c0_12, %c0_13, %c0_14], %27 {strides = array<i32>} : memref<1x8x256xf32, #tpu.memory_space<vmem>>, vector<1x8x256xf32>,
    return
  }
  func.func @transform_0(%arg0: i32, %arg1: i32) -> (i32, i32) {
    %c1_i32 = arith.constant 1 : i32
    %0 = arith.muli %arg0, %c1_i32 : i32
    %1 = arith.addi %0, %arg1 : i32
    %c0_i32 = arith.constant 0 : i32
    %c0_i32_0 = arith.constant 0 : i32
    return %1, %c0_i32 : i32, i32
  }
  func.func @transform_1(%arg0: i32, %arg1: i32) -> (i32, i32) {
    %c0_i32 = arith.constant 0 : i32
    %c0_i32_0 = arith.constant 0 : i32
    %c0_i32_1 = arith.constant 0 : i32
    return %c0_i32, %c0_i32_0 : i32, i32
  }
  func.func @transform_2(%arg0: i32, %arg1: i32) -> (i32, i32) {
    %c0_i32 = arith.constant 0 : i32
    %c0_i32_0 = arith.constant 0 : i32
    %c0_i32_1 = arith.constant 0 : i32
    return %c0_i32, %c0_i32_0 : i32, i32
  }
  func.func @transform_3(%arg0: i32, %arg1: i32) -> (i32, i32, i32) {
    %c0_i32 = arith.constant 0 : i32
    %c0_i32_0 = arith.constant 0 : i32
    %c0_i32_1 = arith.constant 0 : i32
    return %arg0, %c0_i32, %c0_i32_0 : i32, i32, i32
  }
}

</mosaic_0001>

<bundles_post_ra>
// kernel: tpu_custom_call.1
= control target key start
LH: loop header
LB: loop body
LE: loop exit
PB: predicated region body
PF: predicated region fallthrough
CT: control target
= control target key end

     0   :  { %s1838_s0 = inlined_call_operand.hbm [shape: bf16[256,256], index: 0, kind: input, shape index: {}]   ;;  %s1839_s1 = inlined_call_operand.hbm [shape: bf16[256,128], index: 1, kind: input, shape index: {}]   ;;  %s1840_s2 = inlined_call_operand.vmem [shape: f32[1,8], index: 2, kind: input, shape index: {}]   ;;  %s1841_s3 = inlined_call_operand.hbm [shape: f32[2,8,256], index: 3, kind: output, shape index: {}]  }
   0x1   :  { %1842 = sst [smem:[#allocation11_spill]] %s1839_s1 }
   0x2   :  { %8 = vsyncpa [#allocation3], 0 }
   0x3   :  { %10 = vsyncpa [#allocation3 + $0x1], 0 }
   0x4   :  { %11 = vsyncpa [#allocation6], 0 }
   0x5   :  { %12 = vsyncpa [#allocation4], 0 }
   0x6   :  { %14 = vsyncpa [#allocation4 + $0x1], 0  ;;  %s1456_s12 = smov 0   ;;  %s1458_s13 = smov 0  }
   0x7   :  { %s1460_s14 = smov 0   ;;  %s1462_s15 = smov 0  }
   0x8   :  { %s1464_s16 = smov 0   ;;  %s1466_s17 = smov 0  }
   0x9 LB: > { %s913_s18 = sadd.s32 4294967295, %s1427_s17   ;;  %s914_s19 = sadd.s32 4294967294, %s1427_s17   ;;  %s1427_s17 = sphi %s1466_s17, %s20_s17   ;;  %s1423_s16 = sphi %s1464_s16, %s1855_s16   ;;  %s1419_s15 = sphi %s1462_s15, %s1854_s15   ;;  %s1415_s14 = sphi %s1460_s14, %s1853_s14   ;;  %s1411_s13 = sphi %s1458_s13, %s1852_s13   ;;  %s1407_s12 = sphi %s1456_s12, %s1851_s12  }
   0xa   : > { %p54_p0 = scmp.ne.s32.totalorder %s1411_s13, %s1407_s12  ;;  %p1490_p1 = scmp.eq.s32.totalorder %s913_s18, 0 }
   0xb   : > { %p1494_p2 = scmp.eq.s32.totalorder %s913_s18, 1  ;;  %p126_p3 = scmp.eq.s32.totalorder %s914_s19, 1 }
   0xc   : > { %p1500_p4 = por %p1490_p1, %p54_p0  ;;  %p915_p5 = scmp.ge.s32.totalorder %s1427_s17, 1 }
   0xd   : > { %p1505_p6 = por %p126_p3, %p54_p0  ;;  %p133_p7 = scmp.lt.s32.totalorder %s1427_s17, 3 }
   0xe   : > { %s1847_s1 = sld [smem:[#allocation11_spill]]  ;;  %s1429_s28 = smov [#allocation5]  }
   0xf   : > { %p1513_p8 = pnand %p915_p5, %p133_p7  ;;  %s146_s29 = sshll.u32 %s1429_s28, 4  ;;  %s147_s29 = int_to_ptr.vmem [resolvable:$true] %s146_s29 }
  0x10   : > { %p917_p11 = scmp.ge.s32.totalorder %s1427_s17, 2  ;;  %s1430_s30 = smov 64  }
  0x11   : > { %p1146_p9 = pneg %p1513_p8  ;;  %s1431_s4 = smov 4  }
  0x12   : > { %s32_s5 = sadd.s32 1, %s1423_s16  ;;  %s41_s6 = sadd.s32 1, %s1415_s14 }
  0x13   : > { %p1147_p10 = pnand %p1146_p9, %p1490_p1  ;;  %p34_p12 = scmp.ge.s32.totalorder %s32_s5, 2 }
  0x14   : > { %s144_s26 = sshll.u32 %s1847_s1, 4  ;;  %p48_p13 = scmp.ne.s32.totalorder %s1415_s14, %s1411_s13  ;;  %s145_s26 = int_to_ptr.hbm [resolvable:$true] %s144_s26 }
  0x15   : > { %1149 = dma.hbm_to_vmem [thread:$0]  (!%p1147_p10), %s145_s26, 2048, %s147_s29, [#allocation6], %s1430_s30, %s1430_s30, %s1431_s4  }
  0x16   : > { %p49_p0 = scmp.eq.s32.totalorder %s1427_s17, 0  ;;  %s1857_s5 = smov (%p34_p12, %s32_s5), 0 }
  0x17   : > { %p1535_p5 = por %p1494_p2, %p48_p13  ;;  %s38_s9 = ssub.s32 %s1423_s16, %s1857_s5 }
  0x18   : > { %p1529_p3 = por %p49_p0, %p48_p13  ;;  %p1159_p7 = scmp.lt.s32.totalorder %s1427_s17, 2 }
  0x19   : > { %p39_p9 = scmp.eq.s32.totalorder %s38_s9, 0  ;;  %s163_s10 = sand.u32 1, %s1415_s14  }
  0x1a   : > { %s918_s11 = sshll.u32 %s163_s10, 7  ;;  %s1060_s19 = sshll.u32 %s1423_s16, 7 }
  0x1b   : > { %s1544_s18 = scalar_select %p39_p9, %s1415_s14, %s41_s6  }
  0x1c   : > { %s174_s26 = scalar_lea.hbm %s1838_s0, %s1060_s19  ;;  %s167_s28 = scalar_lea.vmem [#allocation2], %s918_s11 }
  0x1d   : > { %s177_s29 = sshll.u32 %s167_s28, 4  ;;  %s175_s21 = sshll.u32 %s174_s26, 4  ;;  %s178_s29 = int_to_ptr.vmem [resolvable:$true] %s177_s29  ;;  %s176_s21 = int_to_ptr.hbm [resolvable:$true] %s175_s21 }
  0x1e   : > { %p1151_p2 = pnand %p1159_p7, %p1529_p3  ;;  %s164_s30 = scalar_lea.sflag [#allocation3], %s163_s10 }
  0x1f   : > { %s1432_s4 = smov 128   ;;  %s1433_s1 = smov 8  }
  0x20   : > { %1153 = dma.hbm_to_vmem [thread:$0]  (!%p1151_p2), %s176_s21, 2048, %s178_s29, %s164_s30, %s1432_s4, %s1432_s4, %s1433_s1  }
  0x21   : > { %189 = sbr.rel (%p1513_p8) target bundleno = 727 (0x2d7), region = 32  ;;  %s1555_s6 = sand.u32 (!%p1513_p8), 1, %s1411_s13  }
  0x22   : > { %s923_s9 = sshll.u32 (!%p1513_p8), %s1555_s6, 7  ;;  %s192_s11 = scalar_lea.sflag (!%p1513_p8), [#allocation3], %s1555_s6 }
  0x23   : > { %s1559_s19 = scalar_lea.vmem (!%p1513_p8), [#allocation2], %s923_s9 }
  0x26   : > { %1394 = dma.done.wait (%p1500_p4), %s192_s11, 2048  }
  0x27   : > { %1396 = vsyncadd (%p1500_p4), %s192_s11, 4294965248 }
  0x28   : > { %1398 = dma.done.wait (%p1490_p1), [#allocation6], 2048  }
  0x29   : > { %1400 = vsyncadd (%p1490_p1), [#allocation6], 4294965248  ;;  %v1084_v0 = vld [vmem:[#allocation5 + $0x38] sm:$0xff]  ;;  %v1083_v2 = vld [vmem:[#allocation5 + $0x30] sm:$0xff]  ;;  %vm574_vm0 = vcmask 64512   ;;  %s1093_s22 = sshll.u32 %s1419_s15, 4 }
  0x2a   : > { %v1092_v1 = vld [vmem:[#allocation5 + $0x78] sm:$0xff]  ;;  %456 = vmatpush.bf16.msra.mxu0 %v1084_v0  ;;  %1094 = vmatpush.bf16.msra.mxu2 %v1084_v0  ;;  %v1091_v3 = vld [vmem:[#allocation5 + $0x70] sm:$0xff]  ;;  %v1082_v4 = vld [vmem:[#allocation5 + $0x28] sm:$0xff]  ;;  %s925_s27 = sshll.u32 %s1555_s6, 4  ;;  %s819_s24 = scalar_lea.hbm %s1841_s3, %s1093_s22 }
  0x2b   : > { %505 = vmatpush.bf16.msra.mxu1 %v1092_v1  ;;  %1102 = vmatpush.bf16.msra.mxu3 %v1092_v1  ;;  %v1090_v5 = vld [vmem:[#allocation5 + $0x68] sm:$0xff]  ;;  %v1081_v6 = vld [vmem:[#allocation5 + $0x20] sm:$0xff]  ;;  %v1080_v8 = vld [vmem:[#allocation5 + $0x18] sm:$0xff]  ;;  %s223_s25 = scalar_lea.vmem [#allocation7], %s925_s27  ;;  %s823_s28 = sshll.u32 %s819_s24, 4  ;;  %s824_s28 = int_to_ptr.hbm [resolvable:$true] %s823_s28 }
  0x2c   : > { %v1089_v7 = vld [vmem:[#allocation5 + $0x60] sm:$0xff]  ;;  %v1088_v9 = vld [vmem:[#allocation5 + $0x58] sm:$0xff]  ;;  %v1079_v10 = vld [vmem:[#allocation5 + $0x10] sm:$0xff]  ;;  %s821_s26 = sshll.u32 %s223_s25, 4  ;;  %s808_s29 = scalar_lea.sflag [#allocation4], %s1555_s6  ;;  %s822_s26 = int_to_ptr.vmem [resolvable:$true] %s821_s26 }
  0x2d   : > { %v1087_v11 = vld [vmem:[#allocation5 + $0x50] sm:$0xff]  ;;  %v1078_v12 = vld [vmem:[#allocation5 + $0x8] sm:$0xff]  ;;  %v1077_v14 = vld [vmem:[#allocation5] sm:$0xff]  ;;  %s1355_s21 = sshra.s32 %s824_s28, 4  ;;  %s1361_s9 = scalar_lea.hbm %s1841_s3, 32  ;;  %s1356_s21 = int_to_ptr.hbm [resolvable:$true] %s1355_s21 }
  0x2e   : > { %457 = vmatpush.bf16.msra.mxu0 %v1083_v2  ;;  %1095 = vmatpush.bf16.msra.mxu2 %v1083_v2  ;;  %v1086_v13 = vld [vmem:[#allocation5 + $0x48] sm:$0xff]  ;;  %v1085_v15 = vld [vmem:[#allocation5 + $0x40] sm:$0xff]  ;;  %v968_v18 = vld [vmem:[%s1559_s19 + $0x50] sm:$0xf]  ;;  %s1357_s30 = scalar_lea.hbm %s1356_s21, 16  ;;  %p1362_p10 = scmp.lt.s32.totalorder %s1356_s21, %s1841_s3 }
  0x2f   : > { %506 = vmatpush.bf16.msra.mxu1 %v1091_v3  ;;  %1103 = vmatpush.bf16.msra.mxu3 %v1091_v3  ;;  %v928_v16 = vld [vmem:[%s1559_s19] sm:$0xf]  ;;  %v1062_v17 = vld [vmem:[%s1559_s19 + $0x4] sm:$0xf0]  ;;  %v1072_v19 = vld [vmem:[%s1559_s19 + $0x54] sm:$0xf0]  ;;  %p1358_p1 = scmp.ne.s32.totalorder %s1356_s21, %s1357_s30  ;;  %p1363_p12 = scmp.lt.s32.totalorder %s1361_s9, %s1357_s30 }
  0x30   : > { %v1061_v20 = vld [vmem:[%s1559_s19 + $0x4] sm:$0xf]  ;;  %v930_v21 = vld [vmem:[%s1559_s19 + $0x8] sm:$0xf0]  ;;  %v1071_v22 = vld [vmem:[%s1559_s19 + $0x54] sm:$0xf]  ;;  %v1577_v24 = vor.u32 %v1062_v17, %v928_v16  ;;  %v969_v25 = vor.u32 %v1072_v19, %v968_v18 }
  0x31   : > { %v970_v23 = vld [vmem:[%s1559_s19 + $0x58] sm:$0xf0]  ;;  %v1579_v26 = vor.u32 %v1061_v20, %v930_v21  ;;  %v984_v28 = vld [vmem:[%s1559_s19 + $0x70] sm:$0xf]  ;;  %v1076_v29 = vld [vmem:[%s1559_s19 + $0x74] sm:$0xf0]  ;;  %p1359_p4 = pnand %p1358_p1, %p1535_p5  ;;  %p1364_p13 = por %p1363_p12, %p1362_p10 }
  0x32   : > { %458 = vmatpush.bf16.msra.mxu0 %v1082_v4  ;;  %1096 = vmatpush.bf16.msra.mxu2 %v1082_v4  ;;  %v973_v27 = vor.u32 %v1071_v22, %v970_v23  ;;  %v1075_v30 = vld [vmem:[%s1559_s19 + $0x74] sm:$0xf]  ;;  %v986_v31 = vld [vmem:[%s1559_s19 + $0x78] sm:$0xf0]  ;;  %v976_v32 = vld [vmem:[%s1559_s19 + $0x60] sm:$0xf]  ;;  %v985_v33 = vor.u32 %v1076_v29, %v984_v28 }
  0x33   : > { %507 = vmatpush.bf16.msra.mxu1 %v1090_v5  ;;  %1104 = vmatpush.bf16.msra.mxu3 %v1090_v5  ;;  %v989_v34 = vor.u32 %v1075_v30, %v986_v31  ;;  %v1074_v35 = vld [vmem:[%s1559_s19 + $0x64] sm:$0xf0]  ;;  %v1073_v36 = vld [vmem:[%s1559_s19 + $0x64] sm:$0xf]  ;;  %v978_v37 = vld [vmem:[%s1559_s19 + $0x68] sm:$0xf0]  ;;  %p1360_p8 = pneg %p1359_p4 }
  0x34   : > { %v977_v38 = vor.u32 %v1074_v35, %v976_v32  ;;  %v981_v39 = vor.u32 %v1073_v36, %v978_v37  ;;  %v936_v40 = vld [vmem:[%s1559_s19 + $0x10] sm:$0xf]  ;;  %v1064_v41 = vld [vmem:[%s1559_s19 + $0x14] sm:$0xf0]  ;;  %v1063_v42 = vld [vmem:[%s1559_s19 + $0x14] sm:$0xf] }
  0x35   : > { %v938_v43 = vld [vmem:[%s1559_s19 + $0x18] sm:$0xf0]  ;;  %v937_v44 = vor.u32 %v1064_v41, %v936_v40  ;;  %v960_v46 = vld [vmem:[%s1559_s19 + $0x40] sm:$0xf]  ;;  %v1070_v47 = vld [vmem:[%s1559_s19 + $0x44] sm:$0xf0]  ;;  %p1365_p0 = pnand %p1364_p13, %p1360_p8 }
  0x36   : > { %459 = vmatpush.bf16.msra.mxu0 %v1081_v6  ;;  %1097 = vmatpush.bf16.msra.mxu2 %v1081_v6  ;;  %v941_v45 = vor.u32 %v1063_v42, %v938_v43  ;;  %v961_v48 = vor.u32 %v1070_v47, %v960_v46  ;;  %v952_v49 = vld [vmem:[%s1559_s19 + $0x30] sm:$0xf]  ;;  %v1068_v50 = vld [vmem:[%s1559_s19 + $0x34] sm:$0xf0]  ;;  %v944_v52 = vld [vmem:[%s1559_s19 + $0x20] sm:$0xf] }
  0x37   : > { %508 = vmatpush.bf16.msra.mxu1 %v1089_v7  ;;  %1105 = vmatpush.bf16.msra.mxu3 %v1089_v7  ;;  %v953_v51 = vor.u32 %v1068_v50, %v952_v49  ;;  %v1066_v53 = vld [vmem:[%s1559_s19 + $0x24] sm:$0xf0]  ;;  %v1065_v55 = vld [vmem:[%s1559_s19 + $0x24] sm:$0xf]  ;;  %v946_v56 = vld [vmem:[%s1559_s19 + $0x28] sm:$0xf0] }
  0x38   : > { %v945_v54 = vor.u32 %v1066_v53, %v944_v52  ;;  %v949_v57 = vor.u32 %v1065_v55, %v946_v56  ;;  %v1069_v58 = vld [vmem:[%s1559_s19 + $0x44] sm:$0xf]  ;;  %v962_v59 = vld [vmem:[%s1559_s19 + $0x48] sm:$0xf0]  ;;  %v1067_v61 = vld [vmem:[%s1559_s19 + $0x34] sm:$0xf] }
  0x39   : > { %v965_v60 = vor.u32 %v1069_v58, %v962_v59  ;;  %v954_v62 = vld [vmem:[%s1559_s19 + $0x38] sm:$0xf0]  ;;  %v1614_v7 = vld [vmem:[%s1840_s2] ss:$0 sm:$0xff] }
  0x3a   : > { %460 = vmatpush.bf16.msra.mxu0 %v1080_v8  ;;  %1098 = vmatpush.bf16.msra.mxu2 %v1080_v8  ;;  %v957_v63 = vor.u32 %v1067_v61, %v954_v62 }
  0x3b   : > { %509 = vmatpush.bf16.msra.mxu1 %v1088_v9  ;;  %1106 = vmatpush.bf16.msra.mxu3 %v1088_v9 }
  0x3e   : > { %461 = vmatpush.bf16.msra.mxu0 %v1079_v10  ;;  %1099 = vmatpush.bf16.msra.mxu2 %v1079_v10 }
  0x3f   : > { %510 = vmatpush.bf16.msra.mxu1 %v1087_v11  ;;  %1107 = vmatpush.bf16.msra.mxu3 %v1087_v11 }
  0x42   : > { %462 = vmatpush.bf16.msra.mxu0 %v1078_v12  ;;  %1100 = vmatpush.bf16.msra.mxu2 %v1078_v12 }
  0x43   : > { %511 = vmatpush.bf16.msra.mxu1 %v1086_v13  ;;  %1108 = vmatpush.bf16.msra.mxu3 %v1086_v13 }
  0x46   : > { %463 = vmatpush.bf16.msra.mxu0 %v1077_v14  ;;  %1101 = vmatpush.bf16.msra.mxu2 %v1077_v14 }
  0x47   : > { %512 = vmatpush.bf16.msra.mxu1 %v1085_v15  ;;  %1109 = vmatpush.bf16.msra.mxu3 %v1085_v15 }
  0x49   : > { %464 = vmatmul.bf16.vlgmr.msra.gmra.mxu0 %v1577_v24  ;;  %489 = vmatmul.bf16.vlgmr.msra.gmra.mxu2 %v969_v25 }
  0x4a   : > { %513 = vmatmul.bf16.vlgmr.msra.gmra.mxu1 %v1579_v26  ;;  %538 = vmatmul.bf16.vlgmr.msra.gmra.mxu3 %v973_v27 }
  0x4b   : > { %777 = vmatpush.bf16.msra.mxu2 %v985_v33  ;;  %790 = vmatpush.bf16.msra.mxu3 %v989_v34 }
  0x4f   : > { %778 = vmatpush.bf16.msra.mxu2 %v977_v38  ;;  %791 = vmatpush.bf16.msra.mxu3 %v981_v39 }
  0x53   : > { %779 = vmatpush.bf16.msra.mxu2 %v969_v25  ;;  %792 = vmatpush.bf16.msra.mxu3 %v973_v27 }
  0x57   : > { %780 = vmatpush.bf16.msra.mxu2 %v961_v48  ;;  %793 = vmatpush.bf16.msra.mxu3 %v965_v60 }
  0x59   : > { %469 = vmatmul.bf16.gmra.mxu0 %v937_v44  ;;  %494 = vmatmul.bf16.gmra.mxu2 %v977_v38 }
  0x5a   : > { %518 = vmatmul.bf16.gmra.mxu1 %v941_v45  ;;  %543 = vmatmul.bf16.gmra.mxu3 %v981_v39 }
  0x5b   : > { %781 = vmatpush.bf16.msra.mxu2 %v953_v51  ;;  %794 = vmatpush.bf16.msra.mxu3 %v957_v63 }
  0x5f   : > { %782 = vmatpush.bf16.msra.mxu2 %v945_v54  ;;  %795 = vmatpush.bf16.msra.mxu3 %v949_v57 }
  0x63   : > { %783 = vmatpush.bf16.msra.mxu2 %v937_v44  ;;  %796 = vmatpush.bf16.msra.mxu3 %v941_v45 }
  0x67   : > { %784 = vmatpush.bf16.msra.mxu2 %v1577_v24  ;;  %797 = vmatpush.bf16.msra.mxu3 %v1579_v26 }
  0x69   : > { %474 = vmatmul.bf16.gmra.mxu0 %v945_v54  ;;  %499 = vmatmul.bf16.gmra.mxu2 %v985_v33 }
  0x6a   : > { %523 = vmatmul.bf16.gmra.mxu1 %v949_v57  ;;  %548 = vmatmul.bf16.gmra.mxu3 %v989_v34 }
  0x79   : > { %479 = vmatmul.bf16.gmra.mxu0 %v953_v51 }
  0x7a   : > { %528 = vmatmul.bf16.gmra.mxu1 %v957_v63 }
  0x89   : > { %484 = vmatmul.bf16.gmra.mxu0 %v961_v48 }
  0x8a   : > { %533 = vmatmul.bf16.gmra.mxu1 %v965_v60 }
  0xc6   : > { %v465_v0 = vpop.f32.mrf.mxu0 }
  0xc7   : > { %v514_v1 = vpop.f32.mrf.mxu1 }
  0xc8   : > { %v1609_v2 = vadd.f32 %v514_v1, %v465_v0 }
  0xca   : > { %v1667_v62 = vadd.f32 %v1614_v7, %v1609_v2 }
  0xcc   : > { %v490_v3 = vpop.f32.mrf.mxu2 }
  0xcd   : > { %v539_v4 = vpop.f32.mrf.mxu3 }
  0xce   : > { %v540_v5 = vadd.f32 %v539_v4, %v490_v3  ;;  %v467_v6 = vpop.f32.mrf.mxu0  ;;  %v575_v3 = vsel %vm574_vm0, %v1667_v62, -inf }
  0xcf   : > { %v516_v8 = vpop.f32.mrf.mxu1 }
  0xd0   : > { %v1616_v9 = vadd.f32 %v516_v8, %v467_v6  ;;  %v1619_v10 = vadd.f32 %v1614_v7, %v540_v5 }
  0xd2   : > { %v605_v11 = vsel %vm574_vm0, %v1619_v10, -inf }
  0xd3   : > { %606 = vmax.xlane.f32.xlu2 %v605_v11 }
  0xd4   : > { %v492_v12 = vpop.f32.mrf.mxu2 }
  0xd5   : > { %v541_v13 = vpop.f32.mrf.mxu3 }
  0xd6   : > { %v542_v14 = vadd.f32 %v541_v13, %v492_v12  ;;  %v470_v15 = vpop.f32.mrf.mxu0 }
  0xd7   : > { %v519_v16 = vpop.f32.mrf.mxu1 }
  0xd8   : > { %v1624_v17 = vadd.f32 %v1614_v7, %v542_v14  ;;  %v520_v0 = vadd.f32 %v519_v16, %v470_v15  ;;  %v1691_v15 = vadd.f32 %v1614_v7, %v1616_v9 }
  0xda   : > { %v608_v18 = vsel %vm574_vm0, %v1624_v17, -inf  ;;  %v1677_v8 = vadd.f32 %v1614_v7, %v520_v0 }
  0xdb   : > { %609 = vmax.xlane.f32.xlu2 %v608_v18  ;;  %v578_v18 = vsel %vm574_vm0, %v1691_v15, -inf }
  0xdc   : > { %v495_v19 = vpop.f32.mrf.mxu2  ;;  %v581_v13 = vsel %vm574_vm0, %v1677_v8, -inf }
  0xdd   : > { %v544_v20 = vpop.f32.mrf.mxu3 }
  0xde   : > { %v545_v21 = vadd.f32 %v544_v20, %v495_v19  ;;  %v472_v22 = vpop.f32.mrf.mxu0 }
  0xdf   : > { %v521_v23 = vpop.f32.mrf.mxu1 }
  0xe0   : > { %v1628_v24 = vadd.f32 %v521_v23, %v472_v22  ;;  %v1631_v25 = vadd.f32 %v1614_v7, %v545_v21 }
  0xe2   : > { %v611_v26 = vsel %vm574_vm0, %v1631_v25, -inf  ;;  %v1699_v19 = vadd.f32 %v1614_v7, %v1628_v24 }
  0xe3   : > { %612 = vmax.xlane.f32.xlu1 %v611_v26 }
  0xe4   : > { %v497_v27 = vpop.f32.mrf.mxu2  ;;  %v584_v20 = vsel %vm574_vm0, %v1699_v19, -inf }
  0xe5   : > { %v546_v28 = vpop.f32.mrf.mxu3 }
  0xe6   : > { %v547_v29 = vadd.f32 %v546_v28, %v497_v27  ;;  %v475_v30 = vpop.f32.mrf.mxu0 }
  0xe7   : > { %v524_v31 = vpop.f32.mrf.mxu1 }
  0xe8   : > { %v1636_v32 = vadd.f32 %v1614_v7, %v547_v29  ;;  %v525_v11 = vadd.f32 %v524_v31, %v475_v30 }
  0xea   : > { %v614_v33 = vsel %vm574_vm0, %v1636_v32, -inf  ;;  %v1687_v14 = vadd.f32 %v1614_v7, %v525_v11 }
  0xeb   : > { %615 = vmax.xlane.f32.xlu1 %v614_v33 }
  0xec   : > { %v500_v34 = vpop.f32.mrf.mxu2  ;;  %v587_v16 = vsel %vm574_vm0, %v1687_v14, -inf }
  0xed   : > { %v549_v35 = vpop.f32.mrf.mxu3 }
  0xee   : > { %v550_v36 = vadd.f32 %v549_v35, %v500_v34  ;;  %v477_v37 = vpop.f32.mrf.mxu0 }
  0xef   : > { %v526_v38 = vpop.f32.mrf.mxu1 }
  0xf0   : > { %v1641_v39 = vadd.f32 %v1614_v7, %v550_v36  ;;  %v527_v50 = vadd.f32 %v526_v38, %v477_v37 }
  0xf2   : > { %v617_v40 = vsel %vm574_vm0, %v1641_v39, -inf  ;;  %v1656_v55 = vadd.f32 %v1614_v7, %v527_v50 }
  0xf3   : > { %618 = vmax.xlane.f32.xlu0 %v617_v40 }
  0xf4   : > { %v502_v41 = vpop.f32.mrf.mxu2  ;;  %v590_v58 = vsel %vm574_vm0, %v1656_v55, -inf }
  0xf5   : > { %v551_v42 = vpop.f32.mrf.mxu3 }
  0xf6   : > { %v552_v43 = vadd.f32 %v551_v42, %v502_v41  ;;  %v480_v44 = vpop.f32.mrf.mxu0 }
  0xf7   : > { %v529_v45 = vpop.f32.mrf.mxu1 }
  0xf8   : > { %v530_v46 = vadd.f32 %v529_v45, %v480_v44  ;;  %v1646_v47 = vadd.f32 %v1614_v7, %v552_v43 }
  0xfa   : > { %v620_v48 = vsel %vm574_vm0, %v1646_v47, -inf  ;;  %v1651_v49 = vadd.f32 %v1614_v7, %v530_v46 }
  0xfb   : > { %621 = vmax.xlane.f32.xlu0 %v620_v48 }
  0xfc   : > { %v593_v51 = vsel %vm574_vm0, %v1651_v49, -inf }
  0xfd   : > { %594 = vmax.xlane.f32.xlu2 %v593_v51 }
  0xfe   : > { %v482_v52 = vpop.f32.mrf.mxu0 }
  0xff   : > { %v531_v53 = vpop.f32.mrf.mxu1 }
 0x100   : > { %v532_v54 = vadd.f32 %v531_v53, %v482_v52 }
 0x102   : > { %v1659_v56 = vadd.f32 %v1614_v7, %v532_v54 }
 0x104   : > { %v596_v57 = vsel %vm574_vm0, %v1659_v56, -inf }
 0x105   : > { %597 = vmax.xlane.f32.xlu0 %v596_v57  ;;  %591 = vmax.xlane.f32.xlu2 %v590_v58 }
 0x106   : > { %v485_v59 = vpop.f32.mrf.mxu0 }
 0x107   : > { %v534_v60 = vpop.f32.mrf.mxu1 }
 0x108   : > { %v535_v61 = vadd.f32 %v534_v60, %v485_v59 }
 0x10a   : > { %v1670_v63 = vadd.f32 %v1614_v7, %v535_v61 }
 0x10c   : > { %v599_v1 = vsel %vm574_vm0, %v1670_v63, -inf }
 0x10d   : > { %600 = vmax.xlane.f32.xlu0 %v599_v1  ;;  %576 = vmax.xlane.f32.xlu2 %v575_v3 }
 0x10e   : > { %v487_v4 = vpop.f32.mrf.mxu0 }
 0x10f   : > { %v536_v5 = vpop.f32.mrf.mxu1 }
 0x110   : > { %v537_v6 = vadd.f32 %v536_v5, %v487_v4 }
 0x112   : > { %v1680_v2 = vadd.f32 %v1614_v7, %v537_v6 }
 0x114   : > { %v602_v12 = vsel %vm574_vm0, %v1680_v2, -inf }
 0x115   : > { %603 = vmax.xlane.f32.xlu1 %v602_v12  ;;  %582 = vmax.xlane.f32.xlu0 %v581_v13 }
 0x11d   : > { %588 = vmax.xlane.f32.xlu1 %v587_v16  ;;  %579 = vmax.xlane.f32.xlu0 %v578_v18 }
 0x125   : > { %585 = vmax.xlane.f32.xlu1 %v584_v20 }
 0x146   : > { %v607_v21 = vpop.xlane.xlu2 %606 }
 0x147   : > { %v633_v9 = vsub.f32 %v1619_v10, %v607_v21 }
 0x149   : > { %v659_v22 = vmul.f32 1.442695, %v633_v9 }
 0x14b   : > { %1217 = vpow2.f32 %v659_v22 }
 0x14e   : > { %v610_v23 = vpop.xlane.xlu2 %609 }
 0x14f   : > { %v634_v26 = vsub.f32 %v1624_v17, %v610_v23 }
 0x151   : > { %v1705_v27 = vpop.eup %1217  ;;  %v661_v28 = vmul.f32 1.442695, %v634_v26 }
 0x152   : > { %v701_v29 = vsel %vm574_vm0, %v1705_v27, 0.0 }
 0x153   : > { %1219 = vpow2.f32 %v661_v28  ;;  %702 = vadd.xlane.f32.xlu2 %v701_v29 }
 0x156   : > { %v613_v7 = vpop.xlane.xlu1 %612 }
 0x157   : > { %v635_v24 = vsub.f32 %v1631_v25, %v613_v7 }
 0x159   : > { %v1710_v30 = vpop.eup %1219  ;;  %v663_v31 = vmul.f32 1.442695, %v635_v24 }
 0x15a   : > { %v704_v10 = vsel %vm574_vm0, %v1710_v30, 0.0 }
 0x15b   : > { %1221 = vpow2.f32 %v663_v31  ;;  %705 = vadd.xlane.f32.xlu0 %v704_v10 }
 0x15e   : > { %v616_v17 = vpop.xlane.xlu1 %615 }
 0x15f   : > { %v636_v33 = vsub.f32 %v1636_v32, %v616_v17 }
 0x161   : > { %v1715_v34 = vpop.eup %1221  ;;  %v665_v35 = vmul.f32 1.442695, %v636_v33 }
 0x162   : > { %v707_v36 = vsel %vm574_vm0, %v1715_v34, 0.0 }
 0x163   : > { %1223 = vpow2.f32 %v665_v35  ;;  %708 = vadd.xlane.f32.xlu0 %v707_v36 }
 0x166   : > { %v619_v25 = vpop.xlane.xlu0 %618 }
 0x167   : > { %v637_v37 = vsub.f32 %v1641_v39, %v619_v25 }
 0x169   : > { %v1720_v38 = vpop.eup %1223  ;;  %v667_v40 = vmul.f32 1.442695, %v637_v37 }
 0x16a   : > { %v710_v41 = vsel %vm574_vm0, %v1720_v38, 0.0 }
 0x16b   : > { %1225 = vpow2.f32 %v667_v40  ;;  %711 = vadd.xlane.f32.xlu1 %v710_v41 }
 0x16e   : > { %v622_v32 = vpop.xlane.xlu0 %621 }
 0x16f   : > { %v638_v42 = vsub.f32 %v1646_v47, %v622_v32 }
 0x170   : > { %v595_v43 = vpop.xlane.xlu2 %594 }
 0x171   : > { %v1725_v44 = vpop.eup %1225  ;;  %v669_v45 = vmul.f32 1.442695, %v638_v42  ;;  %v629_v46 = vsub.f32 %v1651_v49, %v595_v43 }
 0x172   : > { %v713_v39 = vsel %vm574_vm0, %v1725_v44, 0.0 }
 0x173   : > { %1227 = vpow2.f32 %v669_v45  ;;  %v651_v48 = vmul.f32 1.442695, %v629_v46  ;;  %714 = vadd.xlane.f32.xlu1 %v713_v39 }
 0x175   : > { %1229 = vpow2.f32 %v651_v48 }
 0x178   : > { %v598_v50 = vpop.xlane.xlu0 %597  ;;  %v592_v51 = vpop.xlane.xlu2 %591 }
 0x179   : > { %v1730_v52 = vpop.eup %1227  ;;  %v630_v53 = vsub.f32 %v1659_v56, %v598_v50  ;;  %v628_v47 = vsub.f32 %v1656_v55, %v592_v51 }
 0x17a   : > { %v716_v54 = vsel %vm574_vm0, %v1730_v52, 0.0 }
 0x17b   : > { %v1736_v57 = vpop.eup %1229  ;;  %v653_v49 = vmul.f32 1.442695, %v630_v53  ;;  %v649_v58 = vmul.f32 1.442695, %v628_v47  ;;  %717 = vadd.xlane.f32.xlu2 %v716_v54 }
 0x17c   : > { %v689_v59 = vsel %vm574_vm0, %v1736_v57, 0.0 }
 0x17d   : > { %1231 = vpow2.f32 %v653_v49  ;;  %690 = vadd.xlane.f32.xlu0 %v689_v59 }
 0x17e   : > { %1233 = vpow2.f32 %v649_v58 }
 0x180   : > { %v601_v60 = vpop.xlane.xlu0 %600  ;;  %v577_v61 = vpop.xlane.xlu2 %576 }
 0x181   : > { %v631_v56 = vsub.f32 %v1670_v63, %v601_v60  ;;  %v623_v55 = vsub.f32 %v1667_v62, %v577_v61 }
 0x183   : > { %v1742_v0 = vpop.eup %1231  ;;  %v655_v1 = vmul.f32 1.442695, %v631_v56  ;;  %v639_v3 = vmul.f32 1.442695, %v623_v55 }
 0x184   : > { %v1744_v4 = vpop.eup %1233  ;;  %v692_v5 = vsel %vm574_vm0, %v1742_v0, 0.0 }
 0x185   : > { %1235 = vpow2.f32 %v655_v1  ;;  %693 = vadd.xlane.f32.xlu1 %v692_v5  ;;  %v686_v6 = vsel %vm574_vm0, %v1744_v4, 0.0 }
 0x186   : > { %1237 = vpow2.f32 %v639_v3  ;;  %687 = vadd.xlane.f32.xlu0 %v686_v6 }
 0x188   : > { %v604_v11 = vpop.xlane.xlu1 %603  ;;  %v583_v63 = vpop.xlane.xlu0 %582 }
 0x189   : > { %v632_v62 = vsub.f32 %v1680_v2, %v604_v11  ;;  %v625_v12 = vsub.f32 %v1677_v8, %v583_v63 }
 0x18b   : > { %v1752_v13 = vpop.eup %1235  ;;  %v657_v16 = vmul.f32 1.442695, %v632_v62  ;;  %v643_v18 = vmul.f32 1.442695, %v625_v12 }
 0x18c   : > { %v1754_v20 = vpop.eup %1237  ;;  %v695_v21 = vsel %vm574_vm0, %v1752_v13, 0.0 }
 0x18d   : > { %1239 = vpow2.f32 %v657_v16  ;;  %696 = vadd.xlane.f32.xlu1 %v695_v21  ;;  %v671_v9 = vsel %vm574_vm0, %v1754_v20, 0.0 }
 0x18e   : > { %1241 = vpow2.f32 %v643_v18  ;;  %672 = vadd.xlane.f32.xlu0 %v671_v9 }
 0x190   : > { %v589_v22 = vpop.xlane.xlu1 %588  ;;  %v580_v2 = vpop.xlane.xlu0 %579 }
 0x191   : > { %v627_v8 = vsub.f32 %v1687_v14, %v589_v22  ;;  %v624_v23 = vsub.f32 %v1691_v15, %v580_v2 }
 0x193   : > { %v1762_v26 = vpop.eup %1239  ;;  %v647_v28 = vmul.f32 1.442695, %v627_v8  ;;  %v641_v29 = vmul.f32 1.442695, %v624_v23 }
 0x194   : > { %v1764_v7 = vpop.eup %1241  ;;  %v698_v24 = vsel %vm574_vm0, %v1762_v26, 0.0 }
 0x195   : > { %1243 = vpow2.f32 %v647_v28  ;;  %v677_v31 = vsel %vm574_vm0, %v1764_v7, 0.0  ;;  %699 = vadd.xlane.f32.xlu2 %v698_v24 }
 0x196   : > { %1245 = vpow2.f32 %v641_v29  ;;  %678 = vadd.xlane.f32.xlu1 %v677_v31 }
 0x198   : > { %v586_v10 = vpop.xlane.xlu1 %585 }
 0x199   : > { %v626_v14 = vsub.f32 %v1699_v19, %v586_v10 }
 0x19b   : > { %v1771_v15 = vpop.eup %1243  ;;  %v645_v17 = vmul.f32 1.442695, %v626_v14 }
 0x19c   : > { %v1773_v33 = vpop.eup %1245  ;;  %v683_v35 = vsel %vm574_vm0, %v1771_v15, 0.0 }
 0x19d   : > { %1247 = vpow2.f32 %v645_v17  ;;  %v674_v36 = vsel %vm574_vm0, %v1773_v33, 0.0  ;;  %684 = vadd.xlane.f32.xlu2 %v683_v35 }
 0x19e   : > { %675 = vadd.xlane.f32.xlu1 %v674_v36 }
 0x1a3   : > { %v1779_v25 = vpop.eup %1247 }
 0x1a4   : > { %v680_v37 = vsel %vm574_vm0, %v1779_v25, 0.0 }
 0x1a5   : > { %681 = vadd.xlane.f32.xlu2 %v680_v37 }
 0x1c6   : > { %v703_v41 = vpop.xlane.xlu2 %702 }
 0x1ce   : > { %v706_v40 = vpop.xlane.xlu0 %705 }
 0x1d6   : > { %v709_v42 = vpop.xlane.xlu0 %708 }
 0x1de   : > { %v712_v19 = vpop.xlane.xlu1 %711 }
 0x1e6   : > { %v715_v32 = vpop.xlane.xlu1 %714 }
 0x1e7   : > { %1249 = vrcp.f32 %v715_v32 }
 0x1e8   : > { %1251 = vrcp.f32 %v712_v19 }
 0x1ed   : > { %v1250_v45 = vpop.eup %1249 }
 0x1ee   : > { %v718_v43 = vpop.xlane.xlu2 %717  ;;  %v1252_v46 = vpop.eup %1251  ;;  %v749_v48 = vmul.f32 %v1250_v45, %v1725_v44 }
 0x1ef   : > { %1253 = vrcp.f32 %v718_v43  ;;  %v748_v54 = vmul.f32 %v1252_v46, %v1720_v38 }
 0x1f0   : > { %1255 = vrcp.f32 %v709_v42  ;;  %v691_v55 = vpop.xlane.xlu0 %690 }
 0x1f1   : > { %1257 = vrcp.f32 %v706_v40 }
 0x1f2   : > { %1259 = vrcp.f32 %v703_v41 }
 0x1f5   : > { %v1254_v39 = vpop.eup %1253 }
 0x1f6   : > { %v750_v50 = vmul.f32 %v1254_v39, %v1730_v52  ;;  %v1256_v51 = vpop.eup %1255 }
 0x1f7   : > { %v1258_v49 = vpop.eup %1257  ;;  %v747_v58 = vmul.f32 %v1256_v51, %v1715_v34 }
 0x1f8   : > { %v694_v53 = vpop.xlane.xlu1 %693  ;;  %v760_v47 = vpack.c.bf16 %v750_v50, %v749_v48  ;;  %v1260_v59 = vpop.eup %1259  ;;  %v746_v61 = vmul.f32 %v1258_v49, %v1710_v30 }
 0x1f9   : > { %v759_v60 = vpack.c.bf16 %v748_v54, %v747_v58  ;;  %v745_v44 = vmul.f32 %v1260_v59, %v1705_v27  ;;  %v688_v34 = vpop.xlane.xlu0 %687 }
 0x1fa   : > { %1113 = vmatpush.lsf.bf16.msrb.mxu2 %v760_v47  ;;  %1127 = vmatpush.lsf.bf16.msrb.mxu3 %v760_v47 }
 0x1fb   : > { %v758_v56 = vpack.c.bf16 %v746_v61, %v745_v44 }
 0x1fe   : > { %1114 = vmatpush.lsf.bf16.msrb.mxu2 %v759_v60  ;;  %1128 = vmatpush.lsf.bf16.msrb.mxu3 %v759_v60 }
 0x200   : > { %v697_v52 = vpop.xlane.xlu1 %696 }
 0x201   : > { %1261 = vrcp.f32 %v697_v52  ;;  %v673_v2 = vpop.xlane.xlu0 %672 }
 0x202   : > { %1115 = vmatpush.lsf.bf16.msrb.mxu2 %v758_v56  ;;  %1129 = vmatpush.lsf.bf16.msrb.mxu3 %v758_v56  ;;  %1263 = vrcp.f32 %v694_v53 }
 0x207   : > { %v1262_v3 = vpop.eup %1261 }
 0x208   : > { %v700_v38 = vpop.xlane.xlu2 %699  ;;  %v1264_v5 = vpop.eup %1263  ;;  %v743_v11 = vmul.f32 %v1262_v3, %v1752_v13 }
 0x209   : > { %1265 = vrcp.f32 %v700_v38  ;;  %v679_v1 = vpop.xlane.xlu1 %678  ;;  %v742_v12 = vmul.f32 %v1264_v5, %v1742_v0 }
 0x20a   : > { %1267 = vrcp.f32 %v691_v55 }
 0x20b   : > { %1269 = vrcp.f32 %v688_v34 }
 0x20f   : > { %v1266_v6 = vpop.eup %1265 }
 0x210   : > { %v685_v30 = vpop.xlane.xlu2 %684  ;;  %v744_v27 = vmul.f32 %v1266_v6, %v1762_v26  ;;  %v1268_v63 = vpop.eup %1267 }
 0x211   : > { %1271 = vrcp.f32 %v685_v30  ;;  %v741_v16 = vmul.f32 %v1268_v63, %v1736_v57  ;;  %v1270_v18 = vpop.eup %1269  ;;  %v676_v21 = vpop.xlane.xlu1 %675 }
 0x212   : > { %v757_v62 = vpack.c.bf16 %v744_v27, %v743_v11  ;;  %1273 = vrcp.f32 %v679_v1  ;;  %v740_v23 = vmul.f32 %v1270_v18, %v1744_v4 }
 0x213   : > { %v756_v9 = vpack.c.bf16 %v742_v12, %v741_v16  ;;  %1275 = vrcp.f32 %v676_v21 }
 0x214   : > { %1116 = vmatpush.lsf.bf16.msrb.mxu2 %v757_v62  ;;  %1130 = vmatpush.lsf.bf16.msrb.mxu3 %v757_v62 }
 0x217   : > { %v1272_v22 = vpop.eup %1271 }
 0x218   : > { %1117 = vmatpush.lsf.bf16.msrb.mxu2 %v756_v9  ;;  %1131 = vmatpush.lsf.bf16.msrb.mxu3 %v756_v9  ;;  %v682_v13 = vpop.xlane.xlu2 %681  ;;  %v739_v8 = vmul.f32 %v1272_v22, %v1771_v15  ;;  %v1274_v57 = vpop.eup %1273 }
 0x219   : > { %1277 = vrcp.f32 %v682_v13  ;;  %v1276_v26 = vpop.eup %1275  ;;  %v737_v29 = vmul.f32 %v1274_v57, %v1764_v7 }
 0x21a   : > { %v755_v0 = vpack.c.bf16 %v740_v23, %v739_v8  ;;  %1279 = vrcp.f32 %v673_v2  ;;  %v736_v14 = vmul.f32 %v1276_v26, %v1773_v33 }
 0x21c   : > { %1118 = vmatpush.lsf.bf16.msrb.mxu2 %v755_v0  ;;  %1132 = vmatpush.lsf.bf16.msrb.mxu3 %v755_v0 }
 0x21f   : > { %v1278_v28 = vpop.eup %1277 }
 0x220   : > { %v738_v24 = vmul.f32 %v1278_v28, %v1779_v25  ;;  %v1280_v31 = vpop.eup %1279 }
 0x221   : > { %v735_v4 = vmul.f32 %v1280_v31, %v1754_v20 }
 0x222   : > { %v754_v10 = vpack.c.bf16 %v738_v24, %v737_v29 }
 0x223   : > { %v753_v15 = vpack.c.bf16 %v736_v14, %v735_v4 }
 0x224   : > { %1119 = vmatpush.lsf.bf16.msrb.mxu2 %v754_v10  ;;  %1133 = vmatpush.lsf.bf16.msrb.mxu3 %v754_v10 }
 0x228   : > { %1120 = vmatpush.lsf.bf16.msrb.mxu2 %v753_v15  ;;  %1134 = vmatpush.lsf.bf16.msrb.mxu3 %v753_v15 }
 0x22a   : > { %1121 = vllmr.2.mxu2  ;;  %1135 = vllmr.2.mxu3 }
 0x24b   : > { %1122 = vmatmul.lmr.bf16.vlgmr.msra.gmra.2.mxu2  ;;  %1136 = vmatmul.lmr.bf16.vlgmr.msra.gmra.2.mxu3 }
 0x253   : > { %1123 = vmatmul.lmr.bf16.gmra.2.mxu2  ;;  %1137 = vmatmul.lmr.bf16.gmra.2.mxu3 }
 0x2ce   : > { %v786_v20 = vpop.f32.mrf.mxu2  ;;  %v799_v7 = vpop.f32.mrf.mxu3 }
 0x2cf   : > { %805 = vst [vmem:[%s223_s25] sm:$0xff] %v786_v20 }
 0x2d0   : > { %806 = vst [vmem:[%s223_s25 + $0x8] sm:$0xff] %v799_v7 }
 0x2d1   : > { %1368 = shalt.err (!%p1365_p0)
}
 0x2d2   : > { %1144 = dma.vmem_to_hbm [thread:$0]  (%p1535_p5), %s822_s26, 256, %s824_s28, %s808_s29  }
 0x2d6   : > { %v788_v17 = vpop.f32.mrf.mxu2  ;;  %v801_v33 = vpop.f32.mrf.mxu3 }
 0x2d7 PF: > { %s835_s6 = sand.u32 1, %s1407_s12   ;;  %p1155_p3 = pnand %p917_p11, %p1505_p6 }
 0x2d8   : > { %s836_s1 = scalar_lea.sflag [#allocation4], %s835_s6 }
 0x2d9   : > { %p1156_p7 = pneg %p1155_p3 }
 0x2db   : > { %1402 = dma.done.wait (%p1156_p7), %s836_s1, 256  }
 0x2dc   : > { %1404 = vsyncadd (%p1156_p7), %s836_s1, 4294967040  ;;  %s20_s17 = sadd.s32 1, %s1427_s17   ;;  %s1851_s12 = smov %s1411_s13 }
 0x2dd   : > { %p17_p9 = scmp.ge.s32.totalorder %s20_s17, 4   ;;  %s1852_s13 = smov %s1415_s14 }
 0x2de   : > { %s1853_s14 = smov %s1544_s18  ;;  %s1854_s15 = smov %s1423_s16 }
 0x2df   : > { %s1855_s16 = smov %s1857_s5  ;;  %19 = sbr.rel (!%p17_p9) target bundleno = 9 (0x9), region = 85 }
 0x2e4   :  { %842 = vsyncpa [#allocation3], 1 }
 0x2e5   :  { %844 = vsyncpa [#allocation3 + $0x1], 1 }
 0x2e6   :  { %845 = vsyncpa [#allocation6], 1 }
 0x2e7   :  { %846 = vsyncpa [#allocation4], 1 }
 0x2e8   :  { %848 = vsyncpa [#allocation4 + $0x1], 1 }

</bundles_post_ra>
